<compile_context>
chip_gen: v7x
topology: tpu7x:2x2x1
jax: 0.10.0
libtpu: 0.0.40
codegen_flags: <defaults>
</compile_context>

<pallas_src>
import jax
import jax.numpy as jnp
from jax import lax
from jax.experimental import pallas as pl
from jax.experimental.pallas import tpu as pltpu

# ----------------------------------------------------------------------------
# Config (small, self-consistent shapes implied by the module __init__).
# NOTE: the original module requires actor_layers[0] == actor_layers[1] for the
# actor Sequential to be shape-consistent; we honor that.
CONFIGS = {
    "state_space": 8,
    "action_space": 4,
    "actor_layers": [32, 32],
    "critic_layers": [32, 32],
}

LANES = 128          # lane width of the fused hidden layers
OUT_W = 8            # narrow output: lanes [0,4)=probs, lane 4=value, rest 0
TILE_B_MAX = 1024    # cap per-tile rows (VMEM stays at a few hundred KiB)
BATCH = 256          # example batch -> 2 grid steps of 128 rows each

STATE_SPACE = CONFIGS["state_space"]
ACTION_SPACE = CONFIGS["action_space"]


# ----------------------------------------------------------------------------
# Pallas kernel: fused actor+critic forward for one batch tile.
#   x_ref   : (TILE_B, 8)       raw states (f32)
#   w1_ref  : (8, 128)          fused layer-1 weights (bf16, [actor | critic])
#   w23_ref : (2, 128, 128)     fused layer-2/3 weights (bf16, block-diagonal)
#   b_ref   : (3, 128)          fused biases (f32, zero-padded)
#   o_ref   : (TILE_B, 8)       lanes [0,4) = softmax probs, lane 4 = value
def _net_kernel(x_ref, w1_ref, w23_ref, b_ref, o_ref):
    x = x_ref[...]

    # layer 1: actor & critic first Linear fused along output lanes
    z1 = jnp.dot(x.astype(jnp.bfloat16), w1_ref[...],
                 preferred_element_type=jnp.float32) + b_ref[0:1, :]
    h1 = jnp.tanh(z1)

    # layer 2: block-diagonal (actor top-left, critic bottom-right)
    z2 = jnp.dot(h1.astype(jnp.bfloat16), w23_ref[0],
                 preferred_element_type=jnp.float32) + b_ref[1:2, :]
    h2 = jnp.tanh(z2)

    # layer 3: actor logits in lanes [0, A), critic value in lane A
    y = jnp.dot(h2.astype(jnp.bfloat16), w23_ref[1],
                preferred_element_type=jnp.float32) + b_ref[2:3, :]

    # masked softmax over the actor lanes.  Max-subtraction is dropped: tanh
    # outputs are in [-1, 1] and |W3| <= 1/sqrt(32), so |logit| <~ 6 and exp()
    # cannot overflow; masked lanes use a -1e30 literal and underflow to 0.
    lane = lax.broadcasted_iota(jnp.int32, y.shape, 1)
    act_mask = lane < ACTION_SPACE
    e = jnp.exp(jnp.where(act_mask, y, -1e30))
    denom = jnp.sum(e, axis=-1, keepdims=True)
    probs = e / denom          # exact divide: downstream PPO takes log-probs

    # probs in lanes [0,A), critic value in lane A, zeros elsewhere; store the
    # first OUT_W lanes only (narrow, mem-bound-friendly output).
    out = jnp.where(act_mask, probs, y)
    o_ref[...] = out[:, :OUT_W].astype(o_ref.dtype)


# ----------------------------------------------------------------------------
# Batch tile choice: aim for a 2-step grid (one tile per v7x TensorCore),
# tiles a multiple of 8 rows, capped at TILE_B_MAX.
def _tile_b_for(batch):
    bp8 = ((batch + 7) // 8) * 8
    if bp8 <= 8:
        return 8
    half = ((bp8 + 15) // 16) * 8          # ceil(bp8 / 2), rounded up to 8
    return min(half, TILE_B_MAX)


# ----------------------------------------------------------------------------
# Wrapper: grid over batch tiles; params resident via constant index_maps.
def net_forward(x, w1_packed, w23_packed, b_packed):
    B = x.shape[0]
    tile_b = _tile_b_for(B)
    bp = ((B + tile_b - 1) // tile_b) * tile_b
    if bp != B:
        x = jnp.pad(x, ((0, bp - B), (0, 0)))   # pad batch dim only (tail tile)

    out = pl.pallas_call(
        _net_kernel,
        out_shape=jax.ShapeDtypeStruct((bp, OUT_W), jnp.float32),
        grid_spec=pltpu.PrefetchScalarGridSpec(
            num_scalar_prefetch=0,
            grid=(bp // tile_b,),
            in_specs=[
                pl.BlockSpec((tile_b, STATE_SPACE), lambda i: (i, 0)),
                pl.BlockSpec((STATE_SPACE, LANES), lambda i: (0, 0)),
                pl.BlockSpec((2, LANES, LANES), lambda i: (0, 0, 0)),
                pl.BlockSpec((3, LANES), lambda i: (0, 0)),
            ],
            out_specs=pl.BlockSpec((tile_b, OUT_W), lambda i: (i, 0)),
        ),
        compiler_params=pltpu.CompilerParams(
            dimension_semantics=("parallel",)),  # v7x: one tile per TensorCore
    )(x, w1_packed, w23_packed, b_packed)

    probs = out[:B, :ACTION_SPACE]
    value = out[:B, ACTION_SPACE:ACTION_SPACE + 1]
    return probs, value


# ----------------------------------------------------------------------------
# Parameter packing: fuse actor/critic per layer.  Weights in bf16, biases f32.
def pack_params(p, configs):
    s = configs["state_space"]
    a0, a1 = configs["actor_layers"]
    c0, c1 = configs["critic_layers"]
    act = configs["action_space"]

    w1 = jnp.zeros((s, LANES), jnp.float32)
    w23 = jnp.zeros((2, LANES, LANES), jnp.float32)
    b = jnp.zeros((3, LANES), jnp.float32)

    # layer 1: [actor | critic] concatenated along output lanes
    w1 = w1.at[:, :a0].set(p["aw1"]).at[:, a0:a0 + c0].set(p["cw1"])
    b = b.at[0, :a0].set(p["ab1"][0]).at[0, a0:a0 + c0].set(p["cb1"][0])
    # layer 2: block-diagonal
    w23 = (w23.at[0, :a0, :a0].set(p["aw2"])
               .at[0, a0:a0 + c0, a0:a0 + c1].set(p["cw2"]))
    b = b.at[1, :a0].set(p["ab2"][0]).at[1, a0:a0 + c1].set(p["cb2"][0])
    # layer 3: actor -> lanes [0, act), critic -> lane act
    w23 = (w23.at[1, :a1, :act].set(p["aw3"])
               .at[1, a0:a0 + c1, act:act + 1].set(p["cw3"]))
    b = b.at[2, :act].set(p["ab3"][0]).at[2, act:act + 1].set(p["cb3"][0])

    return w1.astype(jnp.bfloat16), w23.astype(jnp.bfloat16), b


# ----------------------------------------------------------------------------
# Deterministic parameter init (PyTorch nn.Linear default: U(-1/sqrt(fan_in), .)),
# weights stored transposed as [in_features, out_features].
def init_params(key, configs):
    s = configs["state_space"]
    a0, a1 = configs["actor_layers"]
    c0, c1 = configs["critic_layers"]
    act = configs["action_space"]

    layer_defs = {
        "aw1": ((s, a0), s), "ab1": ((1, a0), s),
        "aw2": ((a0, a0), a0), "ab2": ((1, a0), a0),
        "aw3": ((a1, act), a1), "ab3": ((1, act), a1),
        "cw1": ((s, c0), s), "cb1": ((1, c0), s),
        "cw2": ((c0, c1), c0), "cb2": ((1, c1), c0),
        "cw3": ((c1, 1), c1), "cb3": ((1, 1), c1),
    }
    params = {}
    for name, (shape, fan_in) in layer_defs.items():
        key, sub = jax.random.split(key)
        bound = 1.0 / jnp.sqrt(jnp.float32(fan_in))
        params[name] = jax.random.uniform(
            sub, shape, dtype=jnp.float32, minval=-bound, maxval=bound
        )
    return params


# Pure-JAX f32 reference (unfused) for sanity checking.
def net_forward_ref(x, p):
    h = jnp.tanh(x @ p["aw1"] + p["ab1"])
    h = jnp.tanh(h @ p["aw2"] + p["ab2"])
    logits = h @ p["aw3"] + p["ab3"]
    probs = jax.nn.softmax(logits, axis=-1)
    c = jnp.tanh(x @ p["cw1"] + p["cb1"])
    c = jnp.tanh(c @ p["cw2"] + p["cb2"])
    value = c @ p["cw3"] + p["cb3"]
    return probs, value


if __name__ == "__main__":
    key = jax.random.PRNGKey(0)
    key, xkey = jax.random.split(key)

    x = jax.random.normal(xkey, (BATCH, STATE_SPACE), dtype=jnp.float32)
    params = init_params(key, CONFIGS)
    w1_packed, w23_packed, b_packed = pack_params(params, CONFIGS)

    probs, value = net_forward(x, w1_packed, w23_packed, b_packed)
    probs = jax.block_until_ready(probs)
    value = jax.block_until_ready(value)

    # correctness check against the pure-JAX f32 reference
    probs_ref, value_ref = net_forward_ref(x, params)
    assert probs.shape == (BATCH, ACTION_SPACE)
    assert value.shape == (BATCH, 1)
    # bf16 weights / activation casts -> loosened tolerance vs the f32 reference
    assert jnp.allclose(probs, probs_ref, atol=5e-2, rtol=5e-2)
    assert jnp.allclose(value, value_ref, atol=5e-2, rtol=5e-2)
    # exact softmax divide -> probs sum to 1 to f32 precision
    assert jnp.allclose(jnp.sum(probs, axis=-1), 1.0, atol=1e-3)

    # TODO(synk): the original Net.forward() raises NotImplementedError; this
    # kernel implements the actor/critic Sequential heads used by PPO instead.
    print("KERNEL_OK")
</pallas_src>

<mosaic_0001>
module attributes {stable_mosaic.version = 11 : i64} {
  func.func @_net_kernel(%arg0: i32, %arg1: memref<128x8xf32, #tpu.memory_space<vmem>>, %arg2: memref<8x128xbf16, #tpu.memory_space<vmem>>, %arg3: memref<2x128x128xbf16, #tpu.memory_space<vmem>>, %arg4: memref<3x128xf32, #tpu.memory_space<vmem>>, %arg5: memref<128x8xf32, #tpu.memory_space<vmem>>) attributes {dimension_semantics = [#tpu.dimension_semantics<parallel>], iteration_bounds = array<i64: 2>, scalar_prefetch = 0 : i64, scratch_operands = 0 : i64, tpu.core_type = #tpu.core_type<tc>, window_params = [{transform_indices = @transform_0, window_bounds = array<i64: 128, 8>}, {pipeline_mode = #tpu.pipeline_mode<synchronous>, transform_indices = @transform_1, window_bounds = array<i64: 8, 128>}, {pipeline_mode = #tpu.pipeline_mode<synchronous>, transform_indices = @transform_2, window_bounds = array<i64: 2, 128, 128>}, {pipeline_mode = #tpu.pipeline_mode<synchronous>, transform_indices = @transform_3, window_bounds = array<i64: 3, 128>}, {transform_indices = @transform_4, window_bounds = array<i64: 128, 8>}]} {
    %c0 = arith.constant 0 : index
    %c0_0 = arith.constant 0 : index
    %0 = vector.load %arg1[%c0, %c0_0] : memref<128x8xf32, #tpu.memory_space<vmem>>, vector<128x8xf32>
    %1 = arith.truncf %0 : vector<128x8xf32> to vector<128x8xbf16>
    %c0_1 = arith.constant 0 : index
    %c0_2 = arith.constant 0 : index
    %2 = vector.load %arg2[%c0_1, %c0_2] : memref<8x128xbf16, #tpu.memory_space<vmem>>, vector<8x128xbf16>
    %cst = arith.constant dense<0.000000e+00> : vector<128x128xf32>
    %3 = tpu.matmul %1, %2, %cst {dimension_numbers = #tpu.dot_dimension_numbers<[1], [0], [0], [1], [0, 0, 1, 1], [], []>} : vector<128x8xbf16>, vector<8x128xbf16>, vector<128x128xf32> -> vector<128x128xf32>
    %c0_3 = arith.constant 0 : index
    %c0_4 = arith.constant 0 : index
    %4 = vector.load %arg4[%c0_3, %c0_4] : memref<3x128xf32, #tpu.memory_space<vmem>>, vector<1x128xf32>
    %5 = vector.broadcast %4 : vector<1x128xf32> to vector<128x128xf32>
    %6 = arith.addf %3, %5 : vector<128x128xf32>
    %7 = math.tanh %6 : vector<128x128xf32>
    %8 = arith.truncf %7 : vector<128x128xf32> to vector<128x128xbf16>
    %c0_5 = arith.constant 0 : index
    %c0_6 = arith.constant 0 : index
    %c0_7 = arith.constant 0 : index
    %9 = vector.load %arg3[%c0_5, %c0_6, %c0_7] : memref<2x128x128xbf16, #tpu.memory_space<vmem>>, vector<1x128x128xbf16>
    %10 = vector.shape_cast %9 : vector<1x128x128xbf16> to vector<128x128xbf16>
    %cst_8 = arith.constant dense<0.000000e+00> : vector<128x128xf32>
    %11 = tpu.matmul %8, %10, %cst_8 {dimension_numbers = #tpu.dot_dimension_numbers<[1], [0], [0], [1], [0, 0, 1, 1], [], []>} : vector<128x128xbf16>, vector<128x128xbf16>, vector<128x128xf32> -> vector<128x128xf32>
    %c1 = arith.constant 1 : index
    %c0_9 = arith.constant 0 : index
    %12 = vector.load %arg4[%c1, %c0_9] : memref<3x128xf32, #tpu.memory_space<vmem>>, vector<1x128xf32>
    %13 = vector.broadcast %12 : vector<1x128xf32> to vector<128x128xf32>
    %14 = arith.addf %11, %13 : vector<128x128xf32>
    %15 = math.tanh %14 : vector<128x128xf32>
    %16 = arith.truncf %15 : vector<128x128xf32> to vector<128x128xbf16>
    %c1_10 = arith.constant 1 : index
    %c0_11 = arith.constant 0 : index
    %c0_12 = arith.constant 0 : index
    %17 = vector.load %arg3[%c1_10, %c0_11, %c0_12] : memref<2x128x128xbf16, #tpu.memory_space<vmem>>, vector<1x128x128xbf16>
    %18 = vector.shape_cast %17 : vector<1x128x128xbf16> to vector<128x128xbf16>
    %cst_13 = arith.constant dense<0.000000e+00> : vector<128x128xf32>
    %19 = tpu.matmul %16, %18, %cst_13 {dimension_numbers = #tpu.dot_dimension_numbers<[1], [0], [0], [1], [0, 0, 1, 1], [], []>} : vector<128x128xbf16>, vector<128x128xbf16>, vector<128x128xf32> -> vector<128x128xf32>
    %c2 = arith.constant 2 : index
    %c0_14 = arith.constant 0 : index
    %20 = vector.load %arg4[%c2, %c0_14] : memref<3x128xf32, #tpu.memory_space<vmem>>, vector<1x128xf32>
    %21 = vector.broadcast %20 : vector<1x128xf32> to vector<128x128xf32>
    %22 = arith.addf %19, %21 : vector<128x128xf32>
    %23 = tpu.iota {dimensions = array<i32: 1>} : vector<128x128xi32>
    %c4_i32 = arith.constant 4 : i32
    %24 = vector.broadcast %c4_i32 : i32 to vector<128x128xi32>
    %25 = arith.cmpi slt, %23, %24 : vector<128x128xi32>
    %cst_15 = arith.constant -1.000000e+30 : f32
    %26 = vector.broadcast %cst_15 : f32 to vector<128x128xf32>
    %27 = arith.select %25, %22, %26 : vector<128x128xi1>, vector<128x128xf32>
    %28 = math.exp %27 : vector<128x128xf32>
    %cst_16 = arith.constant dense<0.000000e+00> : vector<128xf32>
    %29 = vector.multi_reduction <add>, %28, %cst_16 [1] : vector<128x128xf32> to vector<128xf32>
    %30 = vector.shape_cast %29 : vector<128xf32> to vector<128x1xf32>
    %31 = vector.broadcast %30 : vector<128x1xf32> to vector<128x128xf32>
    %32 = arith.divf %28, %31 : vector<128x128xf32>
    %33 = arith.select %25, %32, %22 : vector<128x128xi1>, vector<128x128xf32>
    %34 = vector.extract_strided_slice %33 {offsets = [0, 0], sizes = [128, 8], strides = [1, 1]} : vector<128x128xf32> to vector<128x8xf32>
    %c0_17 = arith.constant 0 : index
    %c0_18 = arith.constant 0 : index
    %35 = vector.load %arg5[%c0_17, %c0_18] : memref<128x8xf32, #tpu.memory_space<vmem>>, vector<128x8xf32>
    tpu.vector_store %arg5[%c0_17, %c0_18], %34 {strides = array<i32>} : memref<128x8xf32, #tpu.memory_space<vmem>>, vector<128x8xf32>,
    return
  }
  func.func @transform_0(%arg0: i32) -> (i32, i32) {
    %c0_i32 = arith.constant 0 : i32
    %c0_i32_0 = arith.constant 0 : i32
    return %arg0, %c0_i32 : i32, i32
  }
  func.func @transform_1(%arg0: i32) -> (i32, i32) {
    %c0_i32 = arith.constant 0 : i32
    %c0_i32_0 = arith.constant 0 : i32
    %c0_i32_1 = arith.constant 0 : i32
    return %c0_i32, %c0_i32_0 : i32, i32
  }
  func.func @transform_2(%arg0: i32) -> (i32, i32, i32) {
    %c0_i32 = arith.constant 0 : i32
    %c0_i32_0 = arith.constant 0 : i32
    %c0_i32_1 = arith.constant 0 : i32
    %c0_i32_2 = arith.constant 0 : i32
    return %c0_i32, %c0_i32_0, %c0_i32_1 : i32, i32, i32
  }
  func.func @transform_3(%arg0: i32) -> (i32, i32) {
    %c0_i32 = arith.constant 0 : i32
    %c0_i32_0 = arith.constant 0 : i32
    %c0_i32_1 = arith.constant 0 : i32
    return %c0_i32, %c0_i32_0 : i32, i32
  }
  func.func @transform_4(%arg0: i32) -> (i32, i32) {
    %c0_i32 = arith.constant 0 : i32
    %c0_i32_0 = arith.constant 0 : i32
    return %arg0, %c0_i32 : i32, i32
  }
}

</mosaic_0001>

<bundles_post_ra>
// kernel: tpu_custom_call.1
= control target key start
LH: loop header
LB: loop body
LE: loop exit
PB: predicated region body
PF: predicated region fallthrough
CT: control target
= control target key end

     0   :  { %s1305_s15 = smov 0   ;;  %s1662_s0 = inlined_call_operand.vmem [shape: f32[256,8], index: 0, kind: input, shape index: {}]   ;;  %s1663_s1 = inlined_call_operand.vmem [shape: bf16[8,128], index: 1, kind: input, shape index: {}]   ;;  %s1664_s2 = inlined_call_operand.vmem [shape: bf16[2,128,128], index: 2, kind: input, shape index: {}]   ;;  %s1665_s3 = inlined_call_operand.vmem [shape: f32[3,128], index: 3, kind: input, shape index: {}]   ;;  %s1666_s4 = inlined_call_operand.vmem [shape: f32[256,8], index: 4, kind: output, shape index: {}]  }
   0x1 LB: > { %s942_s16 = sadd.s32 4294967295, %s1278_s15   ;;  %p946_p0 = scmp.ge.s32.totalorder %s1278_s15, 1  ;;  %s1278_s15 = sphi %s1305_s15, %s14_s15  }
   0x2   : > { %p163_p1 = scmp.lt.s32.totalorder %s1278_s15, 3 }
   0x4   : > { %p164_p2 = pnand %p946_p0, %p163_p1 }
   0x5   : > { %v226_v0 = vld [vmem:[%s1663_s1] sm:$0xf] (!%p164_p2)  ;;  %vm257_vm0 = vcmask (!%p164_p2), 1043456   ;;  %s947_s19 = sshll.u32 (!%p164_p2), %s942_s16, 4  ;;  %v1129_v3 = vld [vmem:[%s1664_s2 + $0x8] sm:$0xff] (!%p164_p2)   ;;  %v1130_v4 = vld [vmem:[%s1664_s2 + $0x10] sm:$0xff] (!%p164_p2)  }
   0x6   : > { %167 = sbr.rel (%p164_p2) target bundleno = 898 (0x382), region = 36  ;;  %v1128_v1 = vld [vmem:[%s1664_s2] sm:$0xff] (!%p164_p2)   ;;  %1119 = vmatprep.subr.msk.bf16.mxu0 (!%p164_p2), %vm257_vm0, %v226_v0  ;;  %v259_v2 = vsel (!%p164_p2), %vm257_vm0, %v226_v0, 0  ;;  %p190_p3 = scmp.lt.s32.totalorder (!%p164_p2), %s947_s19, 31  ;;  %vm232_vm1 = vcmask (!%p164_p2), 64512   ;;  %v1131_v29 = vld [vmem:[%s1664_s2 + $0x18] sm:$0xff] (!%p164_p2)  }
   0x7   : > { %1038 = vmatpush3.bf16.msra.mxu0 (!%p164_p2), %v259_v2  ;;  %1055 = vmatprep.subr.bf16.mxu1 (!%p164_p2), %v1128_v1  ;;  %v1132_v30 = vld [vmem:[%s1664_s2 + $0x20] sm:$0xff] (!%p164_p2)   ;;  %v1133_v31 = vld [vmem:[%s1664_s2 + $0x28] sm:$0xff] (!%p164_p2)   ;;  %v1134_v32 = vld [vmem:[%s1664_s2 + $0x30] sm:$0xff] (!%p164_p2)  }
   0x8   : > { %1056 = vmatpush3.bf16.msra.mxu1 (!%p164_p2), %v1128_v1  ;;  %v1135_v33 = vld [vmem:[%s1664_s2 + $0x38] sm:$0xff] (!%p164_p2)   ;;  %v1136_v34 = vld [vmem:[%s1664_s2 + $0x40] sm:$0xff] (!%p164_p2)   ;;  %v1137_v35 = vld [vmem:[%s1664_s2 + $0x48] sm:$0xff] (!%p164_p2)  }
   0x9   : > { %1057 = vmatprep.subr.bf16.mxu1 (!%p164_p2), %v1129_v3  ;;  %1087 = vmatprep.subr.bf16.mxu0 (!%p164_p2), %v1136_v34  ;;  %v1138_v36 = vld [vmem:[%s1664_s2 + $0x50] sm:$0xff] (!%p164_p2)   ;;  %v1139_v37 = vld [vmem:[%s1664_s2 + $0x58] sm:$0xff] (!%p164_p2)   ;;  %v951_v38 = vld [vmem:[%s1665_s3] ss:$0 sm:$0xff] (!%p164_p2) }
   0xc   : > { %1058 = vmatpush3.bf16.msra.mxu1 (!%p164_p2), %v1129_v3 }
   0xd   : > { %s1668_s19 = smov (!%p190_p3, %s947_s19), 31  ;;  %1059 = vmatprep.subr.bf16.mxu1 %v1130_v4 }
   0xe   : > { %s948_s26 = sshll.u32 %s1668_s19, 3 }
   0xf   : > { %s1333_s29 = scalar_lea.vmem %s1662_s0, %s948_s26  ;;  %s1561_s16 = scalar_lea.vmem %s1666_s4, %s948_s26 }
  0x10   : > { %v202_v5 = vld [vmem:[%s1333_s29] sm:$0xff]  ;;  %v203_v6 = vld [vmem:[%s1333_s29 + $0x8] sm:$0xff]  ;;  %v204_v7 = vld [vmem:[%s1333_s29 + $0x10] sm:$0xff]  ;;  %1060 = vmatpush3.bf16.msra.mxu1 %v1130_v4 }
  0x11   : > { %v218_v8 = vpack.c.bf16 %v203_v6, %v202_v5  ;;  %v205_v9 = vld [vmem:[%s1333_s29 + $0x18] sm:$0xff]  ;;  %v206_v10 = vld [vmem:[%s1333_s29 + $0x20] sm:$0xff]  ;;  %v207_v11 = vld [vmem:[%s1333_s29 + $0x28] sm:$0xff]  ;;  %1061 = vmatprep.subr.bf16.mxu1 %v1131_v29 }
  0x12   : > { %v219_v12 = vpack.c.bf16 %v205_v9, %v204_v7  ;;  %v220_v13 = vpack.c.bf16 %v207_v11, %v206_v10  ;;  %v208_v14 = vld [vmem:[%s1333_s29 + $0x30] sm:$0xff]  ;;  %v209_v15 = vld [vmem:[%s1333_s29 + $0x38] sm:$0xff]  ;;  %v210_v16 = vld [vmem:[%s1333_s29 + $0x40] sm:$0xff] }
  0x13   : > { %1039 = vmatprep.mubr.msk.bf16.mxu0 %vm232_vm1, %v218_v8  ;;  %v211_v17 = vld [vmem:[%s1333_s29 + $0x48] sm:$0xff]  ;;  %v221_v18 = vpack.c.bf16 %v209_v15, %v208_v14  ;;  %v212_v20 = vld [vmem:[%s1333_s29 + $0x50] sm:$0xff]  ;;  %v213_v21 = vld [vmem:[%s1333_s29 + $0x58] sm:$0xff] }
  0x14   : > { %1040 = vmatmul.mubr.msk.bf16.vlgmr.msra.gmra.mrb[0].mxu0 %vm232_vm1, %v219_v12  ;;  %v222_v19 = vpack.c.bf16 %v211_v17, %v210_v16  ;;  %v214_v22 = vld [vmem:[%s1333_s29 + $0x60] sm:$0xff]  ;;  %v215_v23 = vld [vmem:[%s1333_s29 + $0x68] sm:$0xff]  ;;  %v223_v24 = vpack.c.bf16 %v213_v21, %v212_v20  ;;  %v216_v26 = vld [vmem:[%s1333_s29 + $0x70] sm:$0xff]  ;;  %1062 = vmatpush3.bf16.msra.mxu1 %v1131_v29 }
  0x15   : > { %1043 = vmatprep.mubr.msk.bf16.mxu0 %vm232_vm1, %v220_v13  ;;  %v224_v25 = vpack.c.bf16 %v215_v23, %v214_v22  ;;  %v217_v27 = vld [vmem:[%s1333_s29 + $0x78] sm:$0xff]  ;;  %1063 = vmatprep.subr.bf16.mxu1 %v1132_v30 }
  0x16   : > { %v225_v28 = vpack.c.bf16 %v217_v27, %v216_v26  ;;  %1088 = vmatpush3.bf16.msra.mxu0 %v1136_v34  ;;  %v1143_v34 = vld [vmem:[%s1664_s2 + $0x78] sm:$0xff]  }
  0x17   : > { %1089 = vmatprep.subr.bf16.mxu0 %v1137_v35 }
  0x18   : > { %1064 = vmatpush3.bf16.msra.mxu1 %v1132_v30 }
  0x19   : > { %1065 = vmatprep.subr.bf16.mxu1 %v1133_v31 }
  0x1a   : > { %1090 = vmatpush3.bf16.msra.mxu0 %v1137_v35  ;;  %v960_v35 = vld [vmem:[%s1665_s3 + $0x1] ss:$0 sm:$0xff] }
  0x1b   : > { %1091 = vmatprep.subr.bf16.mxu0 %v1138_v36 }
  0x1c   : > { %1044 = vmatmul.mubr.msk.bf16.gmra.mrb[4].mxu0 %vm232_vm1, %v221_v18  ;;  %1066 = vmatpush3.bf16.msra.mxu1 %v1133_v31  ;;  %v1140_v31 = vld [vmem:[%s1664_s2 + $0x60] sm:$0xff]  }
  0x1d   : > { %1047 = vmatprep.mubr.msk.bf16.mxu0 %vm232_vm1, %v222_v19  ;;  %1067 = vmatprep.subr.bf16.mxu1 %v1134_v32 }
  0x1e   : > { %1092 = vmatpush3.bf16.msra.mxu0 %v1138_v36 }
  0x1f   : > { %1093 = vmatprep.subr.bf16.mxu0 %v1139_v37 }
  0x20   : > { %1068 = vmatpush3.bf16.msra.mxu1 %v1134_v32  ;;  %v1141_v32 = vld [vmem:[%s1664_s2 + $0x68] sm:$0xff]  }
  0x21   : > { %1069 = vmatprep.subr.bf16.mxu1 %v1135_v33 }
  0x22   : > { %1094 = vmatpush3.bf16.msra.mxu0 %v1139_v37 }
  0x23   : > { %1095 = vmatprep.subr.bf16.mxu0 %v1140_v31 }
  0x24   : > { %1048 = vmatmul.mubr.msk.bf16.gmra.mrb[8].mxu0 %vm232_vm1, %v223_v24  ;;  %1070 = vmatpush3.bf16.msra.mxu1 %v1135_v33  ;;  %v1142_v33 = vld [vmem:[%s1664_s2 + $0x70] sm:$0xff]  }
  0x25   : > { %1051 = vmatprep.mubr.msk.bf16.mxu0 %vm232_vm1, %v224_v25 }
  0x26   : > { %1096 = vmatpush3.bf16.msra.mxu0 %v1140_v31 }
  0x27   : > { %1097 = vmatprep.subr.bf16.mxu0 %v1141_v32 }
  0x2a   : > { %1098 = vmatpush3.bf16.msra.mxu0 %v1141_v32 }
  0x2b   : > { %1099 = vmatprep.subr.bf16.mxu0 %v1142_v33 }
  0x2c   : > { %1052 = vmatmul.mubr.msk.bf16.gmra.mrb[12].mxu0 %vm232_vm1, %v225_v28 }
  0x2e   : > { %1100 = vmatpush3.bf16.msra.mxu0 %v1142_v33 }
  0x2f   : > { %1101 = vmatprep.subr.bf16.mxu0 %v1143_v34 }
  0x32   : > { %1102 = vmatpush3.bf16.msra.mxu0 %v1143_v34 }
  0xe7   : > { %v1041_v39 = vpop.f32.mrb[0].mxu0 }
  0xe8   : > { %v304_v40 = vadd.f32 %v1041_v39, %v951_v38  ;;  %v295_v41 = vpop.f32.mrb[1].mxu0 }
  0xe9   : > { %v296_v42 = vadd.f32 %v951_v38, %v295_v41  ;;  %v1042_v43 = vpop.f32.mrb[2].mxu0 }
  0xea   : > { %1144 = vtanh.f32 %v304_v40  ;;  %v307_v44 = vadd.f32 %v1042_v43, %v951_v38  ;;  %v298_v45 = vpop.f32.mrb[3].mxu0 }
  0xeb   : > { %1146 = vtanh.f32 %v296_v42  ;;  %v299_v46 = vadd.f32 %v951_v38, %v298_v45 }
  0xec   : > { %1148 = vtanh.f32 %v307_v44 }
  0xed   : > { %1150 = vtanh.f32 %v299_v46 }
  0xef   : > { %v1045_v47 = vpop.f32.mrb[4].mxu0 }
  0xf0   : > { %v320_v48 = vadd.f32 %v1045_v47, %v951_v38  ;;  %v311_v49 = vpop.f32.mrb[5].mxu0 }
  0xf1   : > { %v312_v50 = vadd.f32 %v951_v38, %v311_v49  ;;  %v1046_v51 = vpop.f32.mrb[6].mxu0 }
  0xf2   : > { %1152 = vtanh.f32 %v320_v48  ;;  %v323_v52 = vadd.f32 %v1046_v51, %v951_v38  ;;  %v314_v53 = vpop.f32.mrb[7].mxu0 }
  0xf3   : > { %1154 = vtanh.f32 %v312_v50  ;;  %v315_v54 = vadd.f32 %v951_v38, %v314_v53 }
  0xf4   : > { %v1145_v55 = vpop.eup %1144  ;;  %1156 = vtanh.f32 %v323_v52 }
  0xf5   : > { %v1147_v56 = vpop.eup %1146  ;;  %1158 = vtanh.f32 %v315_v54 }
  0xf6   : > { %v1149_v57 = vpop.eup %1148 }
  0xf7   : > { %v1151_v58 = vpop.eup %1150  ;;  %v1049_v59 = vpop.f32.mrb[8].mxu0  ;;  %v375_v60 = vpack.c.bf16 %v1149_v57, %v1145_v55 }
  0xf8   : > { %v336_v61 = vadd.f32 %v1049_v59, %v951_v38  ;;  %v327_v62 = vpop.f32.mrb[9].mxu0  ;;  %v374_v63 = vpack.c.bf16 %v1151_v58, %v1147_v56 }
  0xf9   : > { %v328_v0 = vadd.f32 %v951_v38, %v327_v62  ;;  %v1050_v1 = vpop.f32.mrb[10].mxu0 }
  0xfa   : > { %1160 = vtanh.f32 %v336_v61  ;;  %v339_v2 = vadd.f32 %v1050_v1, %v951_v38  ;;  %v330_v3 = vpop.f32.mrb[11].mxu0  ;;  %1071 = vmatprep.mubr.bf16.mxu1 %v374_v63 }
  0xfb   : > { %1162 = vtanh.f32 %v328_v0  ;;  %v331_v4 = vadd.f32 %v951_v38, %v330_v3  ;;  %1072 = vmatmul.mubr.bf16.vlgmr.msra.gmra.mrb[0].mxu1 %v375_v60 }
  0xfc   : > { %v1153_v5 = vpop.eup %1152  ;;  %1164 = vtanh.f32 %v339_v2 }
  0xfd   : > { %v1155_v6 = vpop.eup %1154  ;;  %1166 = vtanh.f32 %v331_v4 }
  0xfe   : > { %v1157_v7 = vpop.eup %1156 }
  0xff   : > { %v1159_v8 = vpop.eup %1158  ;;  %v1053_v9 = vpop.f32.mrb[12].mxu0  ;;  %v377_v10 = vpack.c.bf16 %v1157_v7, %v1153_v5 }
 0x100   : > { %v352_v11 = vadd.f32 %v1053_v9, %v951_v38  ;;  %v343_v12 = vpop.f32.mrb[13].mxu0  ;;  %v376_v13 = vpack.c.bf16 %v1159_v8, %v1155_v6 }
 0x101   : > { %v344_v14 = vadd.f32 %v951_v38, %v343_v12  ;;  %v1054_v15 = vpop.f32.mrb[14].mxu0 }
 0x102   : > { %1168 = vtanh.f32 %v352_v11  ;;  %v355_v16 = vadd.f32 %v1054_v15, %v951_v38  ;;  %v346_v17 = vpop.f32.mrb[15].mxu0  ;;  %1075 = vmatprep.mubr.bf16.mxu1 %v376_v13 }
 0x103   : > { %1170 = vtanh.f32 %v344_v14  ;;  %v347_v18 = vadd.f32 %v951_v38, %v346_v17  ;;  %1076 = vmatmul.mubr.bf16.gmra.mrb[4].mxu1 %v377_v10 }
 0x104   : > { %v1161_v19 = vpop.eup %1160  ;;  %1172 = vtanh.f32 %v355_v16 }
 0x105   : > { %v1163_v20 = vpop.eup %1162  ;;  %1174 = vtanh.f32 %v347_v18 }
 0x106   : > { %v1165_v21 = vpop.eup %1164 }
 0x107   : > { %v1167_v22 = vpop.eup %1166  ;;  %v379_v23 = vpack.c.bf16 %v1165_v21, %v1161_v19 }
 0x108   : > { %v378_v24 = vpack.c.bf16 %v1167_v22, %v1163_v20 }
 0x10a   : > { %1079 = vmatprep.mubr.bf16.mxu1 %v378_v24 }
 0x10b   : > { %1080 = vmatmul.mubr.bf16.gmra.mrb[8].mxu1 %v379_v23 }
 0x10c   : > { %v1169_v25 = vpop.eup %1168 }
 0x10d   : > { %v1171_v26 = vpop.eup %1170 }
 0x10e   : > { %v1173_v27 = vpop.eup %1172 }
 0x10f   : > { %v1175_v28 = vpop.eup %1174  ;;  %v381_v29 = vpack.c.bf16 %v1173_v27, %v1169_v25 }
 0x110   : > { %v380_v30 = vpack.c.bf16 %v1175_v28, %v1171_v26  ;;  %v739_v28 = vlaneseq }
 0x112   : > { %1083 = vmatprep.mubr.bf16.mxu1 %v380_v30  ;;  %v1409_v30 = vld [vmem:[%s1665_s3 + $0x2] ss:$0 sm:$0xff] }
 0x113   : > { %1084 = vmatmul.mubr.bf16.gmra.mrb[12].mxu1 %v381_v29  ;;  %v1404_v29 = vand.u32 127, %v739_v28 }
 0x115   : > { %vm741_vm2 = vcmp.lt.s32.totalorder %v1404_v29, 4 }
 0x1ce   : > { %v1073_v36 = vpop.f32.mrb[0].mxu1 }
 0x1cf   : > { %v494_v37 = vadd.f32 %v1073_v36, %v960_v35  ;;  %v485_v38 = vpop.f32.mrb[1].mxu1 }
 0x1d0   : > { %v486_v39 = vadd.f32 %v960_v35, %v485_v38  ;;  %v1074_v40 = vpop.f32.mrb[2].mxu1 }
 0x1d1   : > { %1176 = vtanh.f32 %v494_v37  ;;  %v497_v41 = vadd.f32 %v1074_v40, %v960_v35  ;;  %v488_v42 = vpop.f32.mrb[3].mxu1 }
 0x1d2   : > { %1178 = vtanh.f32 %v486_v39  ;;  %v489_v43 = vadd.f32 %v960_v35, %v488_v42 }
 0x1d3   : > { %1180 = vtanh.f32 %v497_v41 }
 0x1d4   : > { %1182 = vtanh.f32 %v489_v43 }
 0x1d6   : > { %v1077_v44 = vpop.f32.mrb[4].mxu1 }
 0x1d7   : > { %v510_v45 = vadd.f32 %v1077_v44, %v960_v35  ;;  %v501_v46 = vpop.f32.mrb[5].mxu1 }
 0x1d8   : > { %v502_v47 = vadd.f32 %v960_v35, %v501_v46  ;;  %v1078_v48 = vpop.f32.mrb[6].mxu1 }
 0x1d9   : > { %1184 = vtanh.f32 %v510_v45  ;;  %v513_v49 = vadd.f32 %v1078_v48, %v960_v35  ;;  %v504_v50 = vpop.f32.mrb[7].mxu1 }
 0x1da   : > { %1186 = vtanh.f32 %v502_v47  ;;  %v505_v51 = vadd.f32 %v960_v35, %v504_v50 }
 0x1db   : > { %v1177_v52 = vpop.eup %1176  ;;  %1188 = vtanh.f32 %v513_v49 }
 0x1dc   : > { %v1179_v53 = vpop.eup %1178  ;;  %1190 = vtanh.f32 %v505_v51 }
 0x1dd   : > { %v1181_v54 = vpop.eup %1180 }
 0x1de   : > { %v1183_v55 = vpop.eup %1182  ;;  %v1081_v56 = vpop.f32.mrb[8].mxu1  ;;  %v565_v57 = vpack.c.bf16 %v1181_v54, %v1177_v52 }
 0x1df   : > { %v526_v58 = vadd.f32 %v1081_v56, %v960_v35  ;;  %v517_v59 = vpop.f32.mrb[9].mxu1  ;;  %v564_v60 = vpack.c.bf16 %v1183_v55, %v1179_v53 }
 0x1e0   : > { %v518_v61 = vadd.f32 %v960_v35, %v517_v59  ;;  %v1082_v62 = vpop.f32.mrb[10].mxu1 }
 0x1e1   : > { %1192 = vtanh.f32 %v526_v58  ;;  %v529_v63 = vadd.f32 %v1082_v62, %v960_v35  ;;  %v520_v0 = vpop.f32.mrb[11].mxu1  ;;  %1103 = vmatprep.mubr.bf16.mxu0 %v564_v60 }
 0x1e2   : > { %1194 = vtanh.f32 %v518_v61  ;;  %v521_v1 = vadd.f32 %v960_v35, %v520_v0  ;;  %1104 = vmatmul.mubr.bf16.vlgmr.msra.gmra.mrb[16].mxu0 %v565_v57 }
 0x1e3   : > { %v1185_v2 = vpop.eup %1184  ;;  %1196 = vtanh.f32 %v529_v63 }
 0x1e4   : > { %v1187_v3 = vpop.eup %1186  ;;  %1198 = vtanh.f32 %v521_v1 }
 0x1e5   : > { %v1189_v4 = vpop.eup %1188 }
 0x1e6   : > { %v1191_v5 = vpop.eup %1190  ;;  %v1085_v6 = vpop.f32.mrb[12].mxu1  ;;  %v567_v7 = vpack.c.bf16 %v1189_v4, %v1185_v2 }
 0x1e7   : > { %v542_v8 = vadd.f32 %v1085_v6, %v960_v35  ;;  %v533_v9 = vpop.f32.mrb[13].mxu1  ;;  %v566_v10 = vpack.c.bf16 %v1191_v5, %v1187_v3 }
 0x1e8   : > { %v534_v11 = vadd.f32 %v960_v35, %v533_v9  ;;  %v1086_v12 = vpop.f32.mrb[14].mxu1 }
 0x1e9   : > { %1200 = vtanh.f32 %v542_v8  ;;  %v545_v13 = vadd.f32 %v1086_v12, %v960_v35  ;;  %v536_v14 = vpop.f32.mrb[15].mxu1  ;;  %1107 = vmatprep.mubr.bf16.mxu0 %v566_v10 }
 0x1ea   : > { %1202 = vtanh.f32 %v534_v11  ;;  %v537_v15 = vadd.f32 %v960_v35, %v536_v14  ;;  %1108 = vmatmul.mubr.bf16.gmra.mrb[20].mxu0 %v567_v7 }
 0x1eb   : > { %v1193_v16 = vpop.eup %1192  ;;  %1204 = vtanh.f32 %v545_v13 }
 0x1ec   : > { %v1195_v17 = vpop.eup %1194  ;;  %1206 = vtanh.f32 %v537_v15 }
 0x1ed   : > { %v1197_v18 = vpop.eup %1196 }
 0x1ee   : > { %v1199_v19 = vpop.eup %1198  ;;  %v569_v20 = vpack.c.bf16 %v1197_v18, %v1193_v16 }
 0x1ef   : > { %v568_v21 = vpack.c.bf16 %v1199_v19, %v1195_v17 }
 0x1f1   : > { %1111 = vmatprep.mubr.bf16.mxu0 %v568_v21 }
 0x1f2   : > { %1112 = vmatmul.mubr.bf16.gmra.mrb[24].mxu0 %v569_v20 }
 0x1f3   : > { %v1201_v22 = vpop.eup %1200 }
 0x1f4   : > { %v1203_v23 = vpop.eup %1202 }
 0x1f5   : > { %v1205_v24 = vpop.eup %1204 }
 0x1f6   : > { %v1207_v25 = vpop.eup %1206  ;;  %v571_v26 = vpack.c.bf16 %v1205_v24, %v1201_v22 }
 0x1f7   : > { %v570_v27 = vpack.c.bf16 %v1207_v25, %v1203_v23 }
 0x1f9   : > { %1115 = vmatprep.mubr.bf16.mxu0 %v570_v27 }
 0x1fa   : > { %1116 = vmatmul.mubr.bf16.gmra.mrb[28].mxu0 %v571_v26 }
 0x2b5   : > { %v1105_v31 = vpop.f32.mrb[16].mxu0 }
 0x2b6   : > { %v1413_v32 = vadd.f32 %v1105_v31, %v1409_v30  ;;  %v676_v33 = vpop.f32.mrb[17].mxu0 }
 0x2b7   : > { %v1416_v34 = vadd.f32 %v1409_v30, %v676_v33  ;;  %v1106_v35 = vpop.f32.mrb[18].mxu0 }
 0x2b8   : > { %v744_v36 = vsel %vm741_vm2, %v1413_v32, -1e+30  ;;  %v1422_v37 = vadd.f32 %v1106_v35, %v1409_v30  ;;  %v679_v38 = vpop.f32.mrb[19].mxu0 }
 0x2b9   : > { %v762_v39 = vmul.f32 1.442695, %v744_v36  ;;  %v742_v40 = vsel %vm741_vm2, %v1416_v34, -1e+30  ;;  %v1428_v41 = vadd.f32 %v1409_v30, %v679_v38 }
 0x2ba   : > { %v758_v42 = vmul.f32 1.442695, %v742_v40  ;;  %v745_v43 = vsel %vm741_vm2, %v1422_v37, -1e+30 }
 0x2bb   : > { %1208 = vpow2.f32 %v762_v39  ;;  %v764_v44 = vmul.f32 1.442695, %v745_v43  ;;  %v743_v45 = vsel %vm741_vm2, %v1428_v41, -1e+30 }
 0x2bc   : > { %1210 = vpow2.f32 %v758_v42  ;;  %v760_v46 = vmul.f32 1.442695, %v743_v45 }
 0x2bd   : > { %v1109_v47 = vpop.f32.mrb[20].mxu0  ;;  %1212 = vpow2.f32 %v764_v44 }
 0x2be   : > { %v1437_v48 = vadd.f32 %v1109_v47, %v1409_v30  ;;  %v692_v49 = vpop.f32.mrb[21].mxu0  ;;  %1214 = vpow2.f32 %v760_v46 }
 0x2bf   : > { %v1440_v50 = vadd.f32 %v1409_v30, %v692_v49  ;;  %v1110_v51 = vpop.f32.mrb[22].mxu0 }
 0x2c0   : > { %v748_v52 = vsel %vm741_vm2, %v1437_v48, -1e+30  ;;  %v1446_v53 = vadd.f32 %v1110_v51, %v1409_v30  ;;  %v695_v54 = vpop.f32.mrb[23].mxu0 }
 0x2c1   : > { %v770_v55 = vmul.f32 1.442695, %v748_v52  ;;  %v746_v56 = vsel %vm741_vm2, %v1440_v50, -1e+30  ;;  %v1452_v57 = vadd.f32 %v1409_v30, %v695_v54 }
 0x2c2   : > { %v749_v58 = vsel %vm741_vm2, %v1446_v53, -1e+30  ;;  %v766_v61 = vmul.f32 1.442695, %v746_v56 }
 0x2c3   : > { %1216 = vpow2.f32 %v770_v55  ;;  %v772_v59 = vmul.f32 1.442695, %v749_v58  ;;  %v747_v60 = vsel %vm741_vm2, %v1452_v57, -1e+30 }
 0x2c4   : > { %v768_v63 = vmul.f32 1.442695, %v747_v60 }
 0x2c5   : > { %v1460_v62 = vpop.eup %1208  ;;  %1218 = vpow2.f32 %v772_v59  ;;  %v1113_v0 = vpop.f32.mrb[24].mxu0 }
 0x2c6   : > { %v1462_v1 = vpop.eup %1210  ;;  %v1465_v2 = vadd.f32 %v1113_v0, %v1409_v30  ;;  %794 = vadd.xlane.f32.xlu1 %v1460_v62  ;;  %v708_v3 = vpop.f32.mrb[25].mxu0  ;;  %1220 = vpow2.f32 %v766_v61 }
 0x2c7   : > { %v1469_v4 = vadd.f32 %v1409_v30, %v708_v3  ;;  %v1114_v5 = vpop.f32.mrb[26].mxu0  ;;  %790 = vadd.xlane.f32.xlu0 %v1462_v1  ;;  %v1478_v9 = vpop.eup %1212  ;;  %1222 = vpow2.f32 %v768_v63 }
 0x2c8   : > { %v752_v6 = vsel %vm741_vm2, %v1465_v2, -1e+30  ;;  %v1476_v7 = vadd.f32 %v1114_v5, %v1409_v30  ;;  %v711_v8 = vpop.f32.mrb[27].mxu0  ;;  %v1486_v13 = vpop.eup %1214 }
 0x2c9   : > { %v778_v10 = vmul.f32 1.442695, %v752_v6  ;;  %v750_v11 = vsel %vm741_vm2, %v1469_v4, -1e+30  ;;  %v1484_v12 = vadd.f32 %v1409_v30, %v711_v8 }
 0x2ca   : > { %v753_v14 = vsel %vm741_vm2, %v1476_v7, -1e+30  ;;  %796 = vadd.xlane.f32.xlu1 %v1478_v9  ;;  %v774_v17 = vmul.f32 1.442695, %v750_v11 }
 0x2cb   : > { %1224 = vpow2.f32 %v778_v10  ;;  %v780_v15 = vmul.f32 1.442695, %v753_v14  ;;  %v751_v16 = vsel %vm741_vm2, %v1484_v12, -1e+30  ;;  %792 = vadd.xlane.f32.xlu0 %v1486_v13 }
 0x2cc   : > { %v776_v19 = vmul.f32 1.442695, %v751_v16 }
 0x2cd   : > { %v1496_v18 = vpop.eup %1216  ;;  %1226 = vpow2.f32 %v780_v15  ;;  %v1117_v20 = vpop.f32.mrb[28].mxu0 }
 0x2ce   : > { %v1499_v21 = vadd.f32 %v1117_v20, %v1409_v30  ;;  %v724_v22 = vpop.f32.mrb[29].mxu0  ;;  %1228 = vpow2.f32 %v774_v17 }
 0x2cf   : > { %v1501_v23 = vpop.eup %1218  ;;  %v1504_v24 = vadd.f32 %v1409_v30, %v724_v22  ;;  %v1118_v25 = vpop.f32.mrb[30].mxu0  ;;  %802 = vadd.xlane.f32.xlu0 %v1496_v18  ;;  %1230 = vpow2.f32 %v776_v19 }
 0x2d0   : > { %v1508_v26 = vadd.f32 %v1118_v25, %v1409_v30  ;;  %804 = vadd.xlane.f32.xlu1 %v1501_v23  ;;  %v727_v27 = vpop.f32.mrb[31].mxu0  ;;  %v756_v28 = vsel %vm741_vm2, %v1499_v21, -1e+30  ;;  %v1520_v35 = vpop.eup %1220 }
 0x2d1   : > { %v754_v31 = vsel %vm741_vm2, %v1504_v24, -1e+30  ;;  %v1518_v33 = vadd.f32 %v1409_v30, %v727_v27  ;;  %v1522_v38 = vpop.eup %1222  ;;  %v786_v42 = vmul.f32 1.442695, %v756_v28 }
 0x2d2   : > { %v782_v36 = vmul.f32 1.442695, %v754_v31  ;;  %v757_v39 = vsel %vm741_vm2, %v1508_v26, -1e+30 }
 0x2d3   : > { %v755_v40 = vsel %vm741_vm2, %v1518_v33, -1e+30  ;;  %798 = vadd.xlane.f32.xlu0 %v1520_v35  ;;  %v788_v44 = vmul.f32 1.442695, %v757_v39 }
 0x2d4   : > { %1232 = vpow2.f32 %v782_v36  ;;  %v784_v43 = vmul.f32 1.442695, %v755_v40  ;;  %800 = vadd.xlane.f32.xlu1 %v1522_v38 }
 0x2d5   : > { %v1532_v30 = vpop.eup %1224 }
 0x2d6   : > { %1234 = vpow2.f32 %v784_v43 }
 0x2d7   : > { %v1534_v45 = vpop.eup %1226  ;;  %810 = vadd.xlane.f32.xlu0 %v1532_v30  ;;  %1236 = vpow2.f32 %v786_v42 }
 0x2d8   : > { %812 = vadd.xlane.f32.xlu1 %v1534_v45  ;;  %v1538_v46 = vpop.eup %1228  ;;  %1238 = vpow2.f32 %v788_v44 }
 0x2d9   : > { %v1540_v47 = vpop.eup %1230 }
 0x2db   : > { %806 = vadd.xlane.f32.xlu0 %v1538_v46 }
 0x2dc   : > { %808 = vadd.xlane.f32.xlu1 %v1540_v47 }
 0x2de   : > { %v1544_v49 = vpop.eup %1232 }
 0x2df   : > { %814 = vadd.xlane.f32.xlu0 %v1544_v49 }
 0x2e0   : > { %v1547_v51 = vpop.eup %1234 }
 0x2e1   : > { %816 = vadd.xlane.f32.xlu1 %v1547_v51  ;;  %v1550_v52 = vpop.eup %1236 }
 0x2e2   : > { %v1553_v54 = vpop.eup %1238 }
 0x2e3   : > { %818 = vadd.xlane.f32.xlu0 %v1550_v52 }
 0x2e5   : > { %820 = vadd.xlane.f32.xlu1 %v1553_v54 }
 0x353   : > { %v795_v55 = vpop.xlane.xlu1 %794 }
 0x354   : > { %1240 = vrcp.f32 %v795_v55  ;;  %v791_v56 = vpop.xlane.xlu0 %790 }
 0x355   : > { %1242 = vrcp.f32 %v791_v56 }
 0x357   : > { %v797_v58 = vpop.xlane.xlu1 %796 }
 0x358   : > { %1244 = vrcp.f32 %v797_v58  ;;  %v793_v59 = vpop.xlane.xlu0 %792 }
 0x359   : > { %1246 = vrcp.f32 %v793_v59 }
 0x35c   : > { %v803_v60 = vpop.xlane.xlu0 %802 }
 0x35d   : > { %1248 = vrcp.f32 %v803_v60  ;;  %v805_v61 = vpop.xlane.xlu1 %804 }
 0x35e   : > { %v1241_v63 = vpop.eup %1240  ;;  %1250 = vrcp.f32 %v805_v61 }
 0x35f   : > { %v1243_v0 = vpop.eup %1242  ;;  %v827_v3 = vmul.f32 %v1241_v63, %v1460_v62 }
 0x360   : > { %v823_v5 = vmul.f32 %v1243_v0, %v1462_v1  ;;  %v799_v6 = vpop.xlane.xlu0 %798 }
 0x361   : > { %v856_v8 = vsel %vm741_vm2, %v827_v3, %v1413_v32  ;;  %1252 = vrcp.f32 %v799_v6  ;;  %v801_v10 = vpop.xlane.xlu1 %800 }
 0x362   : > { %v1245_v11 = vpop.eup %1244  ;;  %872 = vst.msk [vmem:[%s1561_s16 + $0x10] sm:$0xff] %vm232_vm1, %v856_v8  ;;  %v854_v14 = vsel %vm741_vm2, %v823_v5, %v1416_v34  ;;  %1254 = vrcp.f32 %v801_v10 }
 0x363   : > { %v1247_v62 = vpop.eup %1246  ;;  %870 = vst.msk [vmem:[%s1561_s16] sm:$0xff] %vm232_vm1, %v854_v14  ;;  %v829_v1 = vmul.f32 %v1245_v11, %v1478_v9 }
 0x364   : > { %v825_v15 = vmul.f32 %v1247_v62, %v1486_v13  ;;  %v811_v16 = vpop.xlane.xlu0 %810 }
 0x365   : > { %v857_v32 = vsel %vm741_vm2, %v829_v1, %v1422_v37  ;;  %1256 = vrcp.f32 %v811_v16  ;;  %v813_v17 = vpop.xlane.xlu1 %812 }
 0x366   : > { %873 = vst.msk [vmem:[%s1561_s16 + $0x18] sm:$0xff] %vm232_vm1, %v857_v32  ;;  %v855_v34 = vsel %vm741_vm2, %v825_v15, %v1428_v41  ;;  %1258 = vrcp.f32 %v813_v17 }
 0x367   : > { %v1249_v19 = vpop.eup %1248  ;;  %871 = vst.msk [vmem:[%s1561_s16 + $0x8] sm:$0xff] %vm232_vm1, %v855_v34 }
 0x368   : > { %v1251_v9 = vpop.eup %1250  ;;  %v835_v13 = vmul.f32 %v1249_v19, %v1496_v18  ;;  %v807_v20 = vpop.xlane.xlu0 %806 }
 0x369   : > { %v837_v37 = vmul.f32 %v1251_v9, %v1501_v23  ;;  %1260 = vrcp.f32 %v807_v20  ;;  %v809_v22 = vpop.xlane.xlu1 %808 }
 0x36a   : > { %v860_v25 = vsel %vm741_vm2, %v835_v13, %v1437_v48  ;;  %1262 = vrcp.f32 %v809_v22 }
 0x36b   : > { %v1253_v41 = vpop.eup %1252  ;;  %876 = vst.msk [vmem:[%s1561_s16 + $0x30] sm:$0xff] %vm232_vm1, %v860_v25  ;;  %v861_v27 = vsel %vm741_vm2, %v837_v37, %v1446_v53 }
 0x36c   : > { %v1255_v18 = vpop.eup %1254  ;;  %877 = vst.msk [vmem:[%s1561_s16 + $0x38] sm:$0xff] %vm232_vm1, %v861_v27  ;;  %v831_v23 = vmul.f32 %v1253_v41, %v1520_v35  ;;  %v815_v28 = vpop.xlane.xlu0 %814 }
 0x36d   : > { %v833_v31 = vmul.f32 %v1255_v18, %v1522_v38  ;;  %1264 = vrcp.f32 %v815_v28 }
 0x36e   : > { %v858_v48 = vsel %vm741_vm2, %v831_v23, %v1440_v50  ;;  %v817_v36 = vpop.xlane.xlu1 %816 }
 0x36f   : > { %v1257_v39 = vpop.eup %1256  ;;  %874 = vst.msk [vmem:[%s1561_s16 + $0x20] sm:$0xff] %vm232_vm1, %v858_v48  ;;  %v859_v53 = vsel %vm741_vm2, %v833_v31, %v1452_v57  ;;  %1266 = vrcp.f32 %v817_v36 }
 0x370   : > { %v1259_v35 = vpop.eup %1258  ;;  %875 = vst.msk [vmem:[%s1561_s16 + $0x28] sm:$0xff] %vm232_vm1, %v859_v53  ;;  %v843_v38 = vmul.f32 %v1257_v39, %v1532_v30  ;;  %v819_v40 = vpop.xlane.xlu0 %818 }
 0x371   : > { %v845_v42 = vmul.f32 %v1259_v35, %v1534_v45  ;;  %1268 = vrcp.f32 %v819_v40 }
 0x372   : > { %v864_v50 = vsel %vm741_vm2, %v843_v38, %v1465_v2  ;;  %v821_v43 = vpop.xlane.xlu1 %820 }
 0x373   : > { %v1261_v44 = vpop.eup %1260  ;;  %880 = vst.msk [vmem:[%s1561_s16 + $0x50] sm:$0xff] %vm232_vm1, %v864_v50  ;;  %v865_v57 = vsel %vm741_vm2, %v845_v42, %v1476_v7  ;;  %1270 = vrcp.f32 %v821_v43 }
 0x374   : > { %v1263_v30 = vpop.eup %1262  ;;  %881 = vst.msk [vmem:[%s1561_s16 + $0x58] sm:$0xff] %vm232_vm1, %v865_v57  ;;  %v839_v45 = vmul.f32 %v1261_v44, %v1538_v46 }
 0x375   : > { %v841_v55 = vmul.f32 %v1263_v30, %v1540_v47 }
 0x376   : > { %v862_v2 = vsel %vm741_vm2, %v839_v45, %v1469_v4 }
 0x377   : > { %v1265_v56 = vpop.eup %1264  ;;  %878 = vst.msk [vmem:[%s1561_s16 + $0x40] sm:$0xff] %vm232_vm1, %v862_v2  ;;  %v863_v7 = vsel %vm741_vm2, %v841_v55, %v1484_v12 }
 0x378   : > { %879 = vst.msk [vmem:[%s1561_s16 + $0x48] sm:$0xff] %vm232_vm1, %v863_v7  ;;  %v847_v46 = vmul.f32 %v1265_v56, %v1544_v49 }
 0x379   : > { %v1267_v58 = vpop.eup %1266 }
 0x37a   : > { %v866_v47 = vsel %vm741_vm2, %v847_v46, %v1504_v24  ;;  %v849_v4 = vmul.f32 %v1267_v58, %v1547_v51 }
 0x37b   : > { %v1269_v59 = vpop.eup %1268  ;;  %882 = vst.msk [vmem:[%s1561_s16 + $0x60] sm:$0xff] %vm232_vm1, %v866_v47 }
 0x37c   : > { %v867_v60 = vsel %vm741_vm2, %v849_v4, %v1518_v33  ;;  %v851_v12 = vmul.f32 %v1269_v59, %v1550_v52 }
 0x37d   : > { %v1271_v61 = vpop.eup %1270  ;;  %883 = vst.msk [vmem:[%s1561_s16 + $0x68] sm:$0xff] %vm232_vm1, %v867_v60 }
 0x37e   : > { %v868_v49 = vsel %vm741_vm2, %v851_v12, %v1499_v21  ;;  %v853_v24 = vmul.f32 %v1271_v61, %v1553_v54 }
 0x37f   : > { %884 = vst.msk [vmem:[%s1561_s16 + $0x70] sm:$0xff] %vm232_vm1, %v868_v49 }
 0x380   : > { %v869_v51 = vsel %vm741_vm2, %v853_v24, %v1508_v26 }
 0x381   : > { %885 = vst.msk [vmem:[%s1561_s16 + $0x78] sm:$0xff] %vm232_vm1, %v869_v51 }
 0x382 PF: > { %s14_s15 = sadd.s32 1, %s1278_s15  }
 0x383   : > { %p11_p4 = scmp.ge.s32.totalorder %s14_s15, 4  }
 0x385   :  { %13 = sbr.rel (!%p11_p4) target bundleno = 1 (0x1), region = 67 }

</bundles_post_ra>
